<compile_context>
chip_gen: v7x
topology: tpu7x:2x2x1
jax: 0.10.0
libtpu: 0.0.40
codegen_flags: <defaults>
</compile_context>

<pallas_src>
import functools

import jax
import jax.numpy as jnp
from jax.experimental import pallas as pl
from jax.experimental.pallas import tpu as pltpu


# ------------------------- "config" (synthetic, in-script) -------------------
NUM_OUTPUTS = 1
BALANCE_WEIGHTS = (1.0,)
SB_WEIGHTS = 1.0

LANES = 128  # lane width of the pixel re-layout


# ------------------------------ Pallas kernel --------------------------------
def _focal_sum_kernel(x_ref, t_ref, out_ref, acc_ref, *, num_classes, gamma,
                      rows_total, tiles_per_split, block_rows, needs_mask):
    """One grid step processes a (1, C, S, 128) block of one batch's pixels.

    x_ref  : (1, C, S, 128) logits, pixels dense on (sublane, lane)
    t_ref  : (1, 1, S, 128) i32 targets (num_classes == ignore_index)
    out_ref: (1, 1, 1, 1)   f32 per-(batch, split) focal-loss sum
    acc_ref: (S, 128)       f32 running partial sums (VMEM scratch)
    """
    i = pl.program_id(2)

    @pl.when(i == 0)
    def _():
        acc_ref[...] = jnp.zeros_like(acc_ref)

    x = x_ref[0].astype(jnp.float32)        # (C, S, 128)
    t = t_ref[0, 0]                         # (S, 128)

    # log-softmax over the class axis: C planes of (S,128), pure elementwise VPU
    m = jnp.max(x, axis=0)                                       # (S, 128)
    lse = m + jnp.log(jnp.sum(jnp.exp(x - m[None, :, :]), axis=0))

    # gather the target-class logit via a one-hot select over C
    cls = jax.lax.broadcasted_iota(jnp.int32, x.shape, 0)        # (C, S, 128)
    x_t = jnp.sum(jnp.where(cls == t[None, :, :], x, 0.0), axis=0)

    valid = t != num_classes                                     # ignore_index
    if needs_mask:
        # ragged last row-tile / duplicated (clamped) tail block: mask rows
        # whose global row index is past the end of the pixel array.
        p = pl.program_id(1)
        row0 = (p * tiles_per_split + i) * block_rows
        rows = row0 + jax.lax.broadcasted_iota(jnp.int32, t.shape, 0)
        valid = jnp.logical_and(valid, rows < rows_total)

    logpt = jnp.where(valid, x_t - lse, 0.0)     # -CE (0 where ignored/masked)
    logpt = jnp.minimum(logpt, 0.0)              # guard fp rounding (pt <= 1)
    pt = jnp.exp(logpt)
    omp = 1.0 - pt
    focal = omp * omp if gamma == 2 else omp ** gamma
    # alpha is folded into the final scale in the wrapper
    acc_ref[...] = acc_ref[...] - focal * logpt

    @pl.when(i == pl.num_programs(2) - 1)
    def _():
        out_ref[0, 0] = jnp.sum(acc_ref[...], keepdims=True)     # (1, 1)


# ------------------------------ Python wrapper --------------------------------
def focal_loss_single(logits_nchw, target, *, num_classes=19, alpha=0.5,
                      gamma=2, max_block_rows=512):
    """Equivalent of Focal_loss._forward for one prediction tensor."""
    n, c, h, w = logits_nchw.shape
    nt, ht, wt = target.shape
    # TODO(synk): F.interpolate(mode='bilinear', align_corners=True) path not
    # implemented; shapes match in this synthetic setup so it is never taken.
    assert h == ht and w == wt, "spatial sizes must match (no interpolation path)"

    hw = h * w
    rows = pl.cdiv(hw, LANES)
    hw_round = rows * LANES

    # Free, contiguous reshapes: keep NCHW layout; pixels -> (rows, 128 lanes).
    x = logits_nchw.reshape(n, c, hw)
    t = target.reshape(n, 1, hw).astype(jnp.int32)
    if hw_round != hw:
        # TODO(synk): rare path (HW not a multiple of 128) still copies once;
        # padded pixels carry ignore_index and contribute exactly 0.
        x = jnp.pad(x, ((0, 0), (0, 0), (0, hw_round - hw)))
        t = jnp.pad(t, ((0, 0), (0, 0), (0, hw_round - hw)),
                    constant_values=num_classes)
    x = x.reshape(n, c, rows, LANES)
    t = t.reshape(n, 1, rows, LANES)

    # Sublane tile: full extent when small (always legal); else a multiple of 8.
    if rows <= max_block_rows:
        block_rows = rows
        num_row_tiles = 1
    else:
        block_rows = max_block_rows              # multiple of 8 by construction
        num_row_tiles = pl.cdiv(rows, block_rows)

    # Pixel-axis parallel split so both v7x TensorCores get work even for N==1.
    splits = 2 if num_row_tiles >= 2 else 1
    tiles_per_split = pl.cdiv(num_row_tiles, splits)
    needs_mask = (num_row_tiles * block_rows != rows) or \
                 (splits * tiles_per_split != num_row_tiles)
    last_tile = num_row_tiles - 1

    def row_block(p, i):
        # Clamp so no block is fully out of bounds; clamped duplicates are
        # entirely masked off inside the kernel.
        return jnp.minimum(p * tiles_per_split + i, last_tile)

    kernel = functools.partial(
        _focal_sum_kernel, num_classes=num_classes, gamma=gamma,
        rows_total=rows, tiles_per_split=tiles_per_split,
        block_rows=block_rows, needs_mask=needs_mask)

    partial_sums = pl.pallas_call(
        kernel,
        out_shape=jax.ShapeDtypeStruct((n, splits, 1, 1), jnp.float32),
        grid_spec=pltpu.PrefetchScalarGridSpec(
            num_scalar_prefetch=0,
            grid=(n, splits, tiles_per_split),
            in_specs=[
                pl.BlockSpec((1, c, block_rows, LANES),
                             lambda b, p, i: (b, 0, row_block(p, i), 0)),
                pl.BlockSpec((1, 1, block_rows, LANES),
                             lambda b, p, i: (b, 0, row_block(p, i), 0)),
            ],
            out_specs=pl.BlockSpec((1, 1, 1, 1), lambda b, p, i: (b, p, 0, 0)),
            scratch_shapes=[pltpu.VMEM((block_rows, LANES), jnp.float32)],
        ),
        compiler_params=pltpu.CompilerParams(
            dimension_semantics=("parallel", "parallel", "arbitrary"),
            vmem_limit_bytes=32 * 1024 * 1024),
    )(x, t)

    # mean over ALL original pixels (ignored pixels count in the denominator);
    # alpha folded into this single scalar multiply.
    return (alpha * jnp.sum(partial_sums)) / jnp.float32(n * hw)


def focal_loss_forward(inputs, target, *, num_classes=19, alpha=0.5, gamma=2):
    """Equivalent of Focal_loss.forward with the in-script config."""
    if NUM_OUTPUTS == 1 and not isinstance(inputs, (list, tuple)):
        inputs = [inputs]
    if len(BALANCE_WEIGHTS) == len(inputs):
        return sum(w * focal_loss_single(x, target, num_classes=num_classes,
                                         alpha=alpha, gamma=gamma)
                   for w, x in zip(BALANCE_WEIGHTS, inputs))
    elif len(inputs) == 1:
        return SB_WEIGHTS * focal_loss_single(inputs[0], target,
                                              num_classes=num_classes,
                                              alpha=alpha, gamma=gamma)
    else:
        raise ValueError("lengths of prediction and target are not identical!")


# -------------------------- pure-JAX reference check --------------------------
def _focal_loss_ref(logits_nchw, target, num_classes=19, alpha=0.5, gamma=2):
    n, c, h, w = logits_nchw.shape
    x = jnp.transpose(logits_nchw, (0, 2, 3, 1)).reshape(-1, c).astype(jnp.float32)
    t = target.reshape(-1)
    logp = jax.nn.log_softmax(x, axis=-1)
    safe_t = jnp.where(t == num_classes, 0, t)
    logpt = jnp.take_along_axis(logp, safe_t[:, None], axis=-1)[:, 0]
    logpt = jnp.where(t == num_classes, 0.0, logpt)
    pt = jnp.exp(logpt)
    logpt = alpha * logpt
    loss = -((1.0 - pt) ** gamma) * logpt
    return jnp.mean(loss)


if __name__ == "__main__":
    num_classes = 19

    # --- test 1: small shape, single full-extent row tile (no masking path) ---
    n, c, h, w = 2, num_classes, 16, 16
    key = jax.random.PRNGKey(0)
    k_logits, k_target, k_logits2, k_target2 = jax.random.split(key, 4)
    logits = jax.random.normal(k_logits, (n, c, h, w), dtype=jnp.float32)
    # targets in [0, num_classes]; value == num_classes is the ignore_index
    target = jax.random.randint(k_target, (n, h, w), 0, num_classes + 1,
                                dtype=jnp.int32)

    loss = focal_loss_forward(logits, target, num_classes=num_classes,
                              alpha=0.5, gamma=2)
    loss = jax.block_until_ready(loss)
    ref = _focal_loss_ref(logits, target, num_classes=num_classes,
                          alpha=0.5, gamma=2)
    assert jnp.allclose(loss, ref, rtol=1e-5, atol=1e-6), (loss, ref)

    # --- test 2: exercises multi-tile grid, pixel split, ragged-row masking ---
    n2, h2, w2 = 1, 32, 80                      # HW = 2560 -> rows = 20
    logits2 = jax.random.normal(k_logits2, (n2, c, h2, w2), dtype=jnp.float32)
    target2 = jax.random.randint(k_target2, (n2, h2, w2), 0, num_classes + 1,
                                 dtype=jnp.int32)
    loss2 = focal_loss_single(logits2, target2, num_classes=num_classes,
                              alpha=0.5, gamma=2, max_block_rows=8)
    loss2 = jax.block_until_ready(loss2)
    ref2 = _focal_loss_ref(logits2, target2, num_classes=num_classes,
                           alpha=0.5, gamma=2)
    assert jnp.allclose(loss2, ref2, rtol=1e-5, atol=1e-6), (loss2, ref2)

    print("KERNEL_OK")
</pallas_src>

<mosaic_0001>
module attributes {stable_mosaic.version = 11 : i64} {
  func.func @_focal_sum_kernel(%arg0: i32, %arg1: i32, %arg2: i32, %arg3: memref<1x19x2x128xf32, #tpu.memory_space<vmem>>, %arg4: memref<1x1x2x128xi32, #tpu.memory_space<vmem>>, %arg5: memref<1x1x1x1xf32, #tpu.memory_space<vmem>>, %arg6: memref<2x128xf32, #tpu.memory_space<vmem>>) attributes {dimension_semantics = [#tpu.dimension_semantics<parallel>, #tpu.dimension_semantics<parallel>, #tpu.dimension_semantics<arbitrary>], iteration_bounds = array<i64: 2, 1, 1>, scalar_prefetch = 0 : i64, scratch_operands = 1 : i64, tpu.core_type = #tpu.core_type<tc>, window_params = [{transform_indices = @transform_0, window_bounds = array<i64: 1, 19, 2, 128>}, {transform_indices = @transform_1, window_bounds = array<i64: 1, 1, 2, 128>}, {transform_indices = @transform_2, window_bounds = array<i64: 1, 1, 1, 1>}]} {
    %c0_i32 = arith.constant 0 : i32
    %0 = arith.cmpi eq, %arg2, %c0_i32 : i32
    %1 = arith.extui %0 : i1 to i32
    %c0_i32_0 = arith.constant 0 : i32
    %2 = arith.cmpi ne, %1, %c0_i32_0 : i32
    scf.if %2 {
      %cst_20 = arith.constant 0.000000e+00 : f32
      %40 = vector.broadcast %cst_20 : f32 to vector<2x128xf32>
      %c0_21 = arith.constant 0 : index
      %c0_22 = arith.constant 0 : index
      %41 = vector.load %arg6[%c0_21, %c0_22] : memref<2x128xf32, #tpu.memory_space<vmem>>, vector<2x128xf32>
      tpu.vector_store %arg6[%c0_21, %c0_22], %40 {strides = array<i32>} : memref<2x128xf32, #tpu.memory_space<vmem>>, vector<2x128xf32>,
    } else {
    }
    %c0 = arith.constant 0 : index
    %c0_1 = arith.constant 0 : index
    %c0_2 = arith.constant 0 : index
    %c0_3 = arith.constant 0 : index
    %3 = vector.load %arg3[%c0, %c0_1, %c0_2, %c0_3] : memref<1x19x2x128xf32, #tpu.memory_space<vmem>>, vector<1x19x2x128xf32>
    %4 = vector.shape_cast %3 : vector<1x19x2x128xf32> to vector<19x2x128xf32>
    %c0_4 = arith.constant 0 : index
    %c0_5 = arith.constant 0 : index
    %c0_6 = arith.constant 0 : index
    %c0_7 = arith.constant 0 : index
    %5 = vector.load %arg4[%c0_4, %c0_5, %c0_6, %c0_7] : memref<1x1x2x128xi32, #tpu.memory_space<vmem>>, vector<1x1x2x128xi32>
    %6 = vector.shape_cast %5 : vector<1x1x2x128xi32> to vector<2x128xi32>
    %cst = arith.constant dense<0xFF800000> : vector<2x128xf32>
    %7 = vector.multi_reduction <maximumf>, %4, %cst [0] : vector<19x2x128xf32> to vector<2x128xf32>
    %8 = vector.shape_cast %7 : vector<2x128xf32> to vector<1x2x128xf32>
    %9 = vector.broadcast %8 : vector<1x2x128xf32> to vector<19x2x128xf32>
    %10 = arith.subf %4, %9 : vector<19x2x128xf32>
    %11 = math.exp %10 : vector<19x2x128xf32>
    %cst_8 = arith.constant dense<0.000000e+00> : vector<2x128xf32>
    %12 = vector.multi_reduction <add>, %11, %cst_8 [0] : vector<19x2x128xf32> to vector<2x128xf32>
    %13 = math.log %12 : vector<2x128xf32>
    %14 = arith.addf %7, %13 : vector<2x128xf32>
    %15 = tpu.iota {dimensions = array<i32: 0>} : vector<19x2x128xi32>
    %16 = vector.shape_cast %6 : vector<2x128xi32> to vector<1x2x128xi32>
    %17 = vector.broadcast %16 : vector<1x2x128xi32> to vector<19x2x128xi32>
    %18 = arith.cmpi eq, %15, %17 : vector<19x2x128xi32>
    %cst_9 = arith.constant 0.000000e+00 : f32
    %19 = vector.broadcast %cst_9 : f32 to vector<19x2x128xf32>
    %20 = arith.select %18, %4, %19 : vector<19x2x128xi1>, vector<19x2x128xf32>
    %cst_10 = arith.constant dense<0.000000e+00> : vector<2x128xf32>
    %21 = vector.multi_reduction <add>, %20, %cst_10 [0] : vector<19x2x128xf32> to vector<2x128xf32>
    %c19_i32 = arith.constant 19 : i32
    %22 = vector.broadcast %c19_i32 : i32 to vector<2x128xi32>
    %23 = arith.cmpi ne, %6, %22 : vector<2x128xi32>
    %24 = arith.subf %21, %14 : vector<2x128xf32>
    %cst_11 = arith.constant 0.000000e+00 : f32
    %25 = vector.broadcast %cst_11 : f32 to vector<2x128xf32>
    %26 = arith.select %23, %24, %25 : vector<2x128xi1>, vector<2x128xf32>
    %cst_12 = arith.constant 0.000000e+00 : f32
    %27 = vector.broadcast %cst_12 : f32 to vector<2x128xf32>
    %28 = arith.minimumf %26, %27 : vector<2x128xf32>
    %29 = math.exp %28 : vector<2x128xf32>
    %cst_13 = arith.constant 1.000000e+00 : f32
    %30 = vector.broadcast %cst_13 : f32 to vector<2x128xf32>
    %31 = arith.subf %30, %29 : vector<2x128xf32>
    %32 = arith.mulf %31, %31 : vector<2x128xf32>
    %c0_14 = arith.constant 0 : index
    %c0_15 = arith.constant 0 : index
    %33 = vector.load %arg6[%c0_14, %c0_15] : memref<2x128xf32, #tpu.memory_space<vmem>>, vector<2x128xf32>
    %34 = arith.mulf %32, %28 : vector<2x128xf32>
    %35 = arith.subf %33, %34 : vector<2x128xf32>
    %c0_16 = arith.constant 0 : index
    %c0_17 = arith.constant 0 : index
    %36 = vector.load %arg6[%c0_16, %c0_17] : memref<2x128xf32, #tpu.memory_space<vmem>>, vector<2x128xf32>
    tpu.vector_store %arg6[%c0_16, %c0_17], %35 {strides = array<i32>} : memref<2x128xf32, #tpu.memory_space<vmem>>, vector<2x128xf32>,
    %c0_i32_18 = arith.constant 0 : i32
    %37 = arith.cmpi eq, %arg2, %c0_i32_18 : i32
    %38 = arith.extui %37 : i1 to i32
    %c0_i32_19 = arith.constant 0 : i32
    %39 = arith.cmpi ne, %38, %c0_i32_19 : i32
    scf.if %39 {
      %c0_20 = arith.constant 0 : index
      %c0_21 = arith.constant 0 : index
      %40 = vector.load %arg6[%c0_20, %c0_21] : memref<2x128xf32, #tpu.memory_space<vmem>>, vector<2x128xf32>
      %41 = vector.shape_cast %40 : vector<2x128xf32> to vector<1x2x128xf32>
      %cst_22 = arith.constant dense<0.000000e+00> : vector<1xf32>
      %42 = vector.multi_reduction <add>, %41, %cst_22 [1, 2] : vector<1x2x128xf32> to vector<1xf32>
      %43 = vector.shape_cast %42 : vector<1xf32> to vector<1x1x1xf32>
      %44 = vector.extract %43[0, 0, 0] : f32 from vector<1x1x1xf32>
      %45 = vector.broadcast %44 : f32 to vector<1x1xf32>
      %c0_23 = arith.constant 0 : index
      %c0_24 = arith.constant 0 : index
      %c0_25 = arith.constant 0 : index
      %c0_26 = arith.constant 0 : index
      %46 = vector.load %arg5[%c0_23, %c0_24, %c0_25, %c0_26] : memref<1x1x1x1xf32, #tpu.memory_space<vmem>>, vector<1x1x1x1xf32>
      %47 = vector.shape_cast %46 : vector<1x1x1x1xf32> to vector<1x1xf32>
      %48 = vector.shape_cast %45 : vector<1x1xf32> to vector<1x1x1x1xf32>
      tpu.vector_store %arg5[%c0_23, %c0_24, %c0_25, %c0_26], %48 {strides = array<i32>} : memref<1x1x1x1xf32, #tpu.memory_space<vmem>>, vector<1x1x1x1xf32>,
    } else {
    }
    return
  }
  func.func @transform_0(%arg0: i32, %arg1: i32, %arg2: i32) -> (i32, i32, i32, i32) {
    %c1_i32 = arith.constant 1 : i32
    %0 = arith.muli %arg1, %c1_i32 : i32
    %1 = arith.addi %0, %arg2 : i32
    %c0_i32 = arith.constant 0 : i32
    %2 = arith.minsi %1, %c0_i32 : i32
    %c0_i32_0 = arith.constant 0 : i32
    %c0_i32_1 = arith.constant 0 : i32
    %c0_i32_2 = arith.constant 0 : i32
    return %arg0, %c0_i32_0, %2, %c0_i32_1 : i32, i32, i32, i32
  }
  func.func @transform_1(%arg0: i32, %arg1: i32, %arg2: i32) -> (i32, i32, i32, i32) {
    %c1_i32 = arith.constant 1 : i32
    %0 = arith.muli %arg1, %c1_i32 : i32
    %1 = arith.addi %0, %arg2 : i32
    %c0_i32 = arith.constant 0 : i32
    %2 = arith.minsi %1, %c0_i32 : i32
    %c0_i32_0 = arith.constant 0 : i32
    %c0_i32_1 = arith.constant 0 : i32
    %c0_i32_2 = arith.constant 0 : i32
    return %arg0, %c0_i32_0, %2, %c0_i32_1 : i32, i32, i32, i32
  }
  func.func @transform_2(%arg0: i32, %arg1: i32, %arg2: i32) -> (i32, i32, i32, i32) {
    %c0_i32 = arith.constant 0 : i32
    %c0_i32_0 = arith.constant 0 : i32
    %c0_i32_1 = arith.constant 0 : i32
    return %arg0, %arg1, %c0_i32, %c0_i32_0 : i32, i32, i32, i32
  }
}

</mosaic_0001>

<bundles_post_ra>
// kernel: tpu_custom_call.1
= control target key start
LH: loop header
LB: loop body
LE: loop exit
PB: predicated region body
PF: predicated region fallthrough
CT: control target
= control target key end

     0   :  { %7 = vsyncpa [#allocation4], 0  ;;  %s1282_s0 = inlined_call_operand.hbm [shape: f32[2,19,2,128], index: 0, kind: input, shape index: {}]   ;;  %s1283_s1 = inlined_call_operand.hbm [shape: s32[2,1,2,128], index: 1, kind: input, shape index: {}]   ;;  %s1284_s2 = inlined_call_operand.vmem [shape: f32[2,1,1,1], index: 2, kind: output, shape index: {}]  }
   0x1   :  { %9 = vsyncpa [#allocation4 + $0x1], 0 }
   0x2   :  { %10 = vsyncpa [#allocation6], 0 }
   0x3   :  { %12 = vsyncpa [#allocation6 + $0x1], 0  ;;  %s881_s9 = smov 0   ;;  %s883_s10 = smov 0  }
   0x4   :  { %s885_s11 = smov 0   ;;  %s887_s12 = smov 0  }
   0x5   :  { %s889_s13 = smov 0   ;;  %s891_s14 = smov 0  }
   0x6 LB: > { %s624_s15 = sadd.s32 4294967295, %s859_s14   ;;  %s37_s16 = sadd.s32 1, %s855_s13  ;;  %s859_s14 = sphi %s891_s14, %s18_s14   ;;  %s855_s13 = sphi %s889_s13, %s1295_s13   ;;  %s851_s12 = sphi %s887_s12, %s1294_s12   ;;  %s847_s11 = sphi %s885_s11, %s1293_s11   ;;  %s843_s10 = sphi %s883_s10, %s1292_s10   ;;  %s839_s9 = sphi %s881_s9, %s1291_s9  }
   0x7   : > { %p39_p0 = scmp.ge.s32.totalorder %s37_s16, 2  ;;  %s52_s17 = sadd.s32 1, %s847_s11 }
   0x8   : > { %p59_p1 = scmp.ne.s32.totalorder %s847_s11, %s843_s10  ;;  %p60_p2 = scmp.eq.s32.totalorder %s859_s14, 0 }
   0x9   : > { %s1297_s16 = smov (%p39_p0, %s37_s16), 0  ;;  %p65_p4 = scmp.ne.s32.totalorder %s843_s10, %s839_s9 }
   0xa   : > { %p61_p3 = por %p60_p2, %p59_p1  ;;  %s47_s18 = ssub.s32 %s855_s13, %s1297_s16 }
   0xb   : > { %p66_p5 = scmp.eq.s32.totalorder %s624_s15, 0  ;;  %p50_p6 = scmp.eq.s32.totalorder %s47_s18, 0 }
   0xc   : > { %p651_p8 = scmp.lt.s32.totalorder %s859_s14, 2  ;;  %s929_s21 = sand.u32 1, %s847_s11  }
   0xd   : > { %p920_p7 = por %p66_p5, %p65_p4  ;;  %s636_s22 = smul.u32 608, %s855_s13 }
   0xe   : > { %s926_s20 = scalar_select %p50_p6, %s847_s11, %s52_s17  }
   0xf   : > { %s1286_s19 = scalar_select %p920_p7, 1, 0 }
  0x10   : > { %s635_s23 = smul.u32 38, %s929_s21  ;;  %s936_s26 = scalar_lea.hbm %s1282_s0, %s636_s22 }
  0x11   : > { %p938_p9 = pnand %p651_p8, %p61_p3  ;;  %s152_s30 = scalar_lea.sflag [#allocation4], %s929_s21 }
  0x12   : > { %s155_s28 = scalar_lea.vmem [#allocation3], %s635_s23  ;;  %s745_s3 = scalar_lea.hbm %s936_s26, 608 }
  0x13   : > { %s166_s29 = sshll.u32 %s155_s28, 4  ;;  %p746_p10 = scmp.ne.s32.totalorder %s936_s26, %s745_s3  ;;  %s942_s29 = int_to_ptr.vmem [resolvable:$true] %s166_s29 }
  0x14   : > { %p747_p11 = pneg %p938_p9  ;;  %s750_s6 = scalar_lea.hbm %s1282_s0, 1216 }
  0x15   : > { %p751_p0 = scmp.lt.u32.totalorder %s936_s26, %s1282_s0  ;;  %p752_p1 = scmp.lt.u32.totalorder %s750_s6, %s745_s3 }
  0x16   : > { %p748_p12 = pnand %p747_p11, %p746_p10  ;;  %p754_p3 = scmp.lt.u32.totalorder %s745_s3, %s936_s26 }
  0x17   : > { %p753_p2 = por %p752_p1, %p751_p0 }
  0x18   : > { %p749_p13 = pneg %p748_p12 }
  0x19   : > { %p755_p4 = por %p754_p3, %p753_p2 }
  0x1b   : > { %p756_p5 = pnand %p755_p4, %p749_p13 }
  0x1d   : > { %759 = shalt.err (!%p756_p5)
}
  0x1e   : > { %s760_s9 = scalar_lea.vmem %s942_s29, 608  ;;  %s861_s15 = smov [#allocation3]  }
  0x1f   : > { %p761_p6 = scmp.ne.s32.totalorder %s942_s29, %s760_s9  ;;  %s765_s17 = sshll.u32 %s861_s15, 4  ;;  %s766_s17 = int_to_ptr.vmem [resolvable:$false] %s765_s17 }
  0x20   : > { %s767_s18 = scalar_lea.vmem %s766_s17, 1216  ;;  %p768_p12 = scmp.lt.s32.totalorder %s942_s29, %s766_s17 }
  0x21   : > { %p763_p8 = pnand %p761_p6, %p747_p11  ;;  %p769_p0 = scmp.lt.s32.totalorder %s767_s18, %s760_s9 }
  0x23   : > { %p764_p10 = pneg %p763_p8  ;;  %p770_p1 = por %p769_p0, %p768_p12 }
  0x25   : > { %p771_p2 = pnand %p770_p1, %p764_p10 }
  0x27   : > { %774 = shalt.err (!%p771_p2)
}
  0x28   : > { %s862_s22 = smov 32   ;;  %s863_s23 = smov 2  }
  0x29   : > { %647 = dma.hbm_to_vmem [thread:$0]  (!%p938_p9), %s936_s26, 608, %s942_s29, %s152_s30, %s862_s22, %s862_s22, %s863_s23  }
  0x2a   : > { %p631_p13 = scmp.ge.s32.totalorder %s859_s14, 1  ;;  %p196_p3 = scmp.lt.s32.totalorder %s859_s14, 3 }
  0x2b   : > { %s629_s24 = sshll.u32 %s929_s21, 1  ;;  %s630_s28 = sshll.u32 %s855_s13, 5 }
  0x2c   : > { %p975_p4 = pnand %p631_p13, %p196_p3  ;;  %s180_s3 = scalar_lea.vmem [#allocation5], %s629_s24 }
  0x2d   : > { %s191_s4 = sshll.u32 %s180_s3, 4  ;;  %s983_s7 = scalar_lea.hbm %s1283_s1, %s630_s28  ;;  %s192_s4 = int_to_ptr.vmem [resolvable:$true] %s191_s4 }
  0x2e   : > { %s1288_s25 = scalar_select %p975_p4, 1, 0 }
  0x2f   : > { %s177_s26 = scalar_lea.sflag [#allocation6], %s929_s21  ;;  %s775_s29 = scalar_lea.hbm %s983_s7, 32 }
  0x30   : > { %p776_p5 = scmp.ne.s32.totalorder %s983_s7, %s775_s29  ;;  %s780_s9 = scalar_lea.hbm %s1283_s1, 64 }
  0x31   : > { %p781_p10 = scmp.lt.u32.totalorder %s983_s7, %s1283_s1  ;;  %p782_p12 = scmp.lt.u32.totalorder %s780_s9, %s775_s29 }
  0x32   : > { %p778_p6 = pnand %p776_p5, %p747_p11  ;;  %p784_p1 = scmp.lt.u32.totalorder %s775_s29, %s983_s7 }
  0x33   : > { %p783_p0 = por %p782_p12, %p781_p10 }
  0x34   : > { %p779_p8 = pneg %p778_p6 }
  0x35   : > { %p785_p2 = por %p784_p1, %p783_p0 }
  0x37   : > { %p786_p13 = pnand %p785_p2, %p779_p8 }
  0x39   : > { %789 = shalt.err (!%p786_p13)
}
  0x3a   : > { %s790_s21 = scalar_lea.vmem %s192_s4, 32  ;;  %s864_s18 = smov [#allocation5]  }
  0x3b   : > { %p791_p3 = scmp.ne.s32.totalorder %s192_s4, %s790_s21  ;;  %s795_s22 = sshll.u32 %s864_s18, 4  ;;  %s796_s22 = int_to_ptr.vmem [resolvable:$false] %s795_s22 }
  0x3c   : > { %s797_s23 = scalar_lea.vmem %s796_s22, 64  ;;  %p798_p7 = scmp.lt.s32.totalorder %s192_s4, %s796_s22 }
  0x3d   : > { %p793_p5 = pnand %p791_p3, %p747_p11  ;;  %p799_p4 = scmp.lt.s32.totalorder %s797_s23, %s790_s21 }
  0x3f   : > { %p794_p6 = pneg %p793_p5  ;;  %p800_p10 = por %p799_p4, %p798_p7 }
  0x41   : > { %p801_p12 = pnand %p800_p10, %p794_p6 }
  0x43   : > { %804 = shalt.err (!%p801_p12)
}
  0x44   : > { %650 = dma.hbm_to_vmem [thread:$0]  (!%p938_p9), %s983_s7, 32, %s192_s4, %s177_s26  }
  0x45   : > { %p1289_p8 = scmp.ne.s32.totalorder %s1288_s25, 0 }
  0x46   : > { %s202_s24 = sand.u32 (!%p1289_p8), 1, %s843_s10   ;;  %p1290_p11 = scmp.ne.s32.totalorder (!%p1289_p8), %s1286_s19, 0 }
  0x47   : > { %200 = sbr.rel (%p1289_p8) target bundleno = 410 (0x19a), region = 28  ;;  %s203_s3 = scalar_lea.sflag (!%p1289_p8), [#allocation4], %s202_s24 }
  0x48   : > { %s637_s28 = smul.u32 (!%p1289_p8), 38, %s202_s24 }
  0x4a   : > { %s1008_s5 = scalar_lea.vmem (!%p1289_p8), [#allocation3], %s637_s28 }
  0x4e   : > { %830 = dma.done.wait (%p1290_p11), %s203_s3, 608  }
  0x4f   : > { %832 = vsyncadd (%p1290_p11), %s203_s3, 4294966688  ;;  %s632_s6 = sshll.u32 %s202_s24, 1  ;;  %s212_s27 = scalar_lea.sflag [#allocation6], %s202_s24 }
  0x50   : > { %s1014_s29 = scalar_lea.vmem [#allocation5], %s632_s6 }
  0x51   : > { %834 = dma.done.wait (%p1290_p11), %s212_s27, 32  }
  0x52   : > { %836 = vsyncadd (%p1290_p11), %s212_s27, 4294967264  ;;  %v865_v0 = vmov 0.0   ;;  %vm279_vm0 = vcmask 1041408   ;;  %v1021_v1 = vld [vmem:[%s1008_s5] sm:$0x3]  ;;  %p248_p7 = scmp.lt.s32.totalorder %s851_s12, 1 }
  0x53   : > { %258 = vst [vmem:[#allocation2] sm:$0x3] %v865_v0  ;;  %v1024_v2 = vld [vmem:[%s1008_s5 + $0x2] sm:$0x3]  ;;  %v1027_v3 = vld [vmem:[%s1008_s5 + $0x4] sm:$0x3] }
  0x54   : > { %v1030_v4 = vld [vmem:[%s1008_s5 + $0x6] sm:$0x3]  ;;  %v1033_v5 = vld [vmem:[%s1008_s5 + $0x8] sm:$0x3]  ;;  %v1036_v6 = vld [vmem:[%s1008_s5 + $0xa] sm:$0x3] }
  0x55   : > { %v1039_v7 = vld [vmem:[%s1008_s5 + $0xc] sm:$0x3]  ;;  %v1042_v8 = vld [vmem:[%s1008_s5 + $0xe] sm:$0x3]  ;;  %v1045_v9 = vld [vmem:[%s1008_s5 + $0x10] sm:$0x3] }
  0x56   : > { %v1048_v10 = vld [vmem:[%s1008_s5 + $0x12] sm:$0x3]  ;;  %v1051_v11 = vld [vmem:[%s1008_s5 + $0x14] sm:$0x3]  ;;  %v280_v12 = vsel %vm279_vm0, %v1021_v1, -inf  ;;  %v281_v13 = vsel %vm279_vm0, %v1024_v2, -inf }
  0x57   : > { %v1058_v14 = vld [vmem:[%s1008_s5 + $0x16] sm:$0x3]  ;;  %v282_v15 = vsel %vm279_vm0, %v1027_v3, -inf  ;;  %v283_v16 = vsel %vm279_vm0, %v1030_v4, -inf  ;;  %v284_v17 = vsel %vm279_vm0, %v1033_v5, -inf  ;;  %v286_v18 = vsel %vm279_vm0, %v1036_v6, -inf }
  0x58   : > { %v1069_v19 = vld [vmem:[%s1008_s5 + $0x18] sm:$0x3]  ;;  %v1072_v20 = vld [vmem:[%s1008_s5 + $0x1a] sm:$0x3]  ;;  %v285_v21 = vmax.f32 %v280_v12, %v284_v17  ;;  %v287_v22 = vmax.f32 %v281_v13, %v286_v18  ;;  %v288_v23 = vsel %vm279_vm0, %v1039_v7, -inf  ;;  %v290_v24 = vsel %vm279_vm0, %v1042_v8, -inf }
  0x59   : > { %v1079_v25 = vld [vmem:[%s1008_s5 + $0x1c] sm:$0x3]  ;;  %v1082_v26 = vld [vmem:[%s1008_s5 + $0x1e] sm:$0x3]  ;;  %v289_v27 = vmax.f32 %v282_v15, %v288_v23  ;;  %v291_v28 = vmax.f32 %v283_v16, %v290_v24  ;;  %v292_v29 = vsel %vm279_vm0, %v1045_v9, -inf  ;;  %v294_v30 = vsel %vm279_vm0, %v1048_v10, -inf }
  0x5a   : > { %v1089_v31 = vld [vmem:[%s1008_s5 + $0x20] sm:$0x3]  ;;  %v1092_v32 = vld [vmem:[%s1008_s5 + $0x22] sm:$0x3]  ;;  %v293_v33 = vmax.f32 %v285_v21, %v292_v29  ;;  %v295_v34 = vmax.f32 %v287_v22, %v294_v30  ;;  %v296_v35 = vsel %vm279_vm0, %v1051_v11, -inf  ;;  %v298_v36 = vsel %vm279_vm0, %v1058_v14, -inf }
  0x5b   : > { %v1099_v37 = vld [vmem:[%s1008_s5 + $0x24] sm:$0x3]  ;;  %v297_v38 = vmax.f32 %v289_v27, %v296_v35  ;;  %v299_v39 = vmax.f32 %v291_v28, %v298_v36  ;;  %v300_v40 = vsel %vm279_vm0, %v1069_v19, -inf  ;;  %v302_v41 = vsel %vm279_vm0, %v1072_v20, -inf  ;;  %v1132_v17 = vld [vmem:[%s1014_s29] sm:$0x3] }
  0x5c   : > { %v301_v42 = vmax.f32 %v293_v33, %v300_v40  ;;  %v303_v43 = vmax.f32 %v295_v34, %v302_v41  ;;  %v304_v44 = vsel %vm279_vm0, %v1079_v25, -inf  ;;  %v306_v45 = vsel %vm279_vm0, %v1082_v26, -inf  ;;  %s1299_s12 = smov (!%p248_p7, %s851_s12), 1 }
  0x5d   : > { %v305_v46 = vmax.f32 %v297_v38, %v304_v44  ;;  %v307_v47 = vmax.f32 %v299_v39, %v306_v45  ;;  %v308_v48 = vsel %vm279_vm0, %v1089_v31, -inf  ;;  %v310_v49 = vsel %vm279_vm0, %v1092_v32, -inf  ;;  %s253_s4 = scalar_lea.vmem %s1284_s2, %s1299_s12 }
  0x5e   : > { %v309_v50 = vmax.f32 %v301_v42, %v308_v48  ;;  %v311_v51 = vmax.f32 %v303_v43, %v310_v49  ;;  %v312_v52 = vsel %vm279_vm0, %v1099_v37, -inf  ;;  %vm414_vm1 = vcmp.eq.s32.totalorder %v1132_v17, 0 }
  0x5f   : > { %v313_v53 = vmax.f32 %v305_v46, %v312_v52  ;;  %vm415_vm2 = vcmp.eq.s32.totalorder %v1132_v17, 1  ;;  %vm416_vm3 = vcmp.eq.s32.totalorder %v1132_v17, 2  ;;  %vm417_vm4 = vcmp.eq.s32.totalorder %v1132_v17, 3 }
  0x60   : > { %v314_v54 = vmax.f32 %v309_v50, %v311_v51  ;;  %vm418_vm5 = vcmp.eq.s32.totalorder %v1132_v17, 4  ;;  %vm419_vm6 = vcmp.eq.s32.totalorder %v1132_v17, 5  ;;  %vm420_vm7 = vcmp.eq.s32.totalorder %v1132_v17, 6 }
  0x61   : > { %v315_v55 = vmax.f32 %v313_v53, %v307_v47  ;;  %v433_v30 = vsel %vm414_vm1, %v1021_v1, 0.0  ;;  %vm421_vm8 = vcmp.eq.s32.totalorder %v1132_v17, 7  ;;  %v434_v34 = vsel %vm415_vm2, %v1024_v2, 0.0 }
  0x62   : > { %v435_v35 = vsel %vm416_vm3, %v1027_v3, 0.0  ;;  %vm422_vm9 = vcmp.eq.s32.totalorder %v1132_v17, 8  ;;  %v436_v41 = vsel %vm417_vm4, %v1030_v4, 0.0  ;;  %vm423_vm10 = vcmp.eq.s32.totalorder %v1132_v17, 9 }
  0x63   : > { %v1115_v56 = vmax.f32 %v314_v54, %v315_v55  ;;  %v453_v43 = vsel %vm279_vm0, %v434_v34, 0.0  ;;  %v455_v44 = vsel %vm279_vm0, %v435_v35, 0.0  ;;  %vm424_vm11 = vcmp.eq.s32.totalorder %v1132_v17, 10 }
  0x64   : > { %v457_v52 = vsel %vm279_vm0, %v436_v41, 0.0  ;;  %vm425_vm12 = vcmp.eq.s32.totalorder %v1132_v17, 11  ;;  %vm426_vm13 = vcmp.eq.s32.totalorder %v1132_v17, 12  ;;  %vm427_vm14 = vcmp.eq.s32.totalorder %v1132_v17, 13 }
  0x65   : > { %v317_v57 = vsub.f32 %v1021_v1, %v1115_v56  ;;  %v318_v58 = vsub.f32 %v1024_v2, %v1115_v56  ;;  %v319_v59 = vsub.f32 %v1027_v3, %v1115_v56  ;;  %v320_v60 = vsub.f32 %v1030_v4, %v1115_v56 }
  0x66   : > { %v321_v61 = vsub.f32 %v1033_v5, %v1115_v56  ;;  %v322_v62 = vsub.f32 %v1036_v6, %v1115_v56  ;;  %v323_v0 = vsub.f32 %v1039_v7, %v1115_v56  ;;  %v324_v18 = vsub.f32 %v1042_v8, %v1115_v56 }
  0x67   : > { %v336_v63 = vmul.f32 1.442695, %v317_v57  ;;  %v338_v12 = vmul.f32 1.442695, %v318_v58  ;;  %v340_v13 = vmul.f32 1.442695, %v319_v59  ;;  %v325_v22 = vsub.f32 %v1045_v9, %v1115_v56 }
  0x68   : > { %v342_v15 = vmul.f32 1.442695, %v320_v60  ;;  %v344_v16 = vmul.f32 1.442695, %v321_v61  ;;  %v346_v21 = vmul.f32 1.442695, %v322_v62  ;;  %v326_v24 = vsub.f32 %v1048_v10, %v1115_v56 }
  0x69   : > { %703 = vpow2.f32 %v336_v63  ;;  %v348_v23 = vmul.f32 1.442695, %v323_v0  ;;  %v350_v27 = vmul.f32 1.442695, %v324_v18  ;;  %v327_v28 = vsub.f32 %v1051_v11, %v1115_v56 }
  0x6a   : > { %705 = vpow2.f32 %v338_v12  ;;  %v352_v29 = vmul.f32 1.442695, %v325_v22  ;;  %v328_v33 = vsub.f32 %v1058_v14, %v1115_v56  ;;  %v329_v36 = vsub.f32 %v1069_v19, %v1115_v56 }
  0x6b   : > { %707 = vpow2.f32 %v340_v13  ;;  %v354_v38 = vmul.f32 1.442695, %v326_v24  ;;  %v330_v1 = vsub.f32 %v1072_v20, %v1115_v56  ;;  %v356_v40 = vmul.f32 1.442695, %v327_v28 }
  0x6c   : > { %709 = vpow2.f32 %v342_v15  ;;  %v452_v2 = vsel %vm279_vm0, %v433_v30, 0.0  ;;  %v358_v46 = vmul.f32 1.442695, %v328_v33  ;;  %v437_v4 = vsel %vm418_vm5, %v1033_v5, 0.0 }
  0x6d   : > { %711 = vpow2.f32 %v344_v16  ;;  %v454_v48 = vadd.f32 %v453_v43, %v452_v2  ;;  %v331_v54 = vsub.f32 %v1079_v25, %v1115_v56  ;;  %v438_v5 = vsel %vm419_vm6, %v1036_v6, 0.0 }
  0x6e   : > { %713 = vpow2.f32 %v346_v21  ;;  %v360_v59 = vmul.f32 1.442695, %v329_v36  ;;  %v459_v61 = vsel %vm279_vm0, %v437_v4, 0.0  ;;  %v332_v62 = vsub.f32 %v1082_v26, %v1115_v56 }
  0x6f   : > { %715 = vpow2.f32 %v348_v23  ;;  %v456_v57 = vadd.f32 %v455_v44, %v454_v48  ;;  %v439_v0 = vsel %vm420_vm7, %v1039_v7, 0.0  ;;  %v362_v13 = vmul.f32 1.442695, %v330_v1 }
  0x70   : > { %717 = vpow2.f32 %v350_v27  ;;  %v461_v16 = vsel %vm279_vm0, %v438_v5, 0.0  ;;  %v333_v18 = vsub.f32 %v1089_v31, %v1115_v56  ;;  %v440_v22 = vsel %vm421_vm8, %v1042_v8, 0.0 }
  0x71   : > { %719 = vpow2.f32 %v352_v29  ;;  %v458_v12 = vadd.f32 %v457_v52, %v456_v57  ;;  %v364_v7 = vmul.f32 1.442695, %v331_v54  ;;  %v463_v28 = vsel %vm279_vm0, %v439_v0, 0.0 }
  0x72   : > { %721 = vpow2.f32 %v354_v38  ;;  %v334_v29 = vsub.f32 %v1092_v32, %v1115_v56  ;;  %v441_v33 = vsel %vm422_vm9, %v1045_v9, 0.0  ;;  %v366_v8 = vmul.f32 1.442695, %v332_v62 }
  0x73   : > { %v704_v39 = vpop.eup %703  ;;  %723 = vpow2.f32 %v356_v40  ;;  %v460_v23 = vadd.f32 %v459_v61, %v458_v12  ;;  %v465_v38 = vsel %vm279_vm0, %v440_v22, 0.0  ;;  %v442_v40 = vsel %vm423_vm10, %v1048_v10, 0.0 }
  0x74   : > { %v706_v42 = vpop.eup %705  ;;  %v374_v3 = vsel %vm279_vm0, %v704_v39, 0.0  ;;  %725 = vpow2.f32 %v358_v46  ;;  %v335_v39 = vsub.f32 %v1099_v37, %v1115_v56  ;;  %v368_v9 = vmul.f32 1.442695, %v333_v18 }
  0x75   : > { %v708_v45 = vpop.eup %707  ;;  %v375_v47 = vsel %vm279_vm0, %v706_v42, 0.0  ;;  %727 = vpow2.f32 %v360_v59  ;;  %v462_v34 = vadd.f32 %v461_v16, %v460_v23  ;;  %v443_v44 = vsel %vm424_vm11, %v1051_v11, 0.0 }
  0x76   : > { %v710_v49 = vpop.eup %709  ;;  %v376_v50 = vadd.f32 %v375_v47, %v374_v3  ;;  %v377_v51 = vsel %vm279_vm0, %v708_v45, 0.0  ;;  %729 = vpow2.f32 %v362_v13  ;;  %v467_v3 = vsel %vm279_vm0, %v441_v33, 0.0 }
  0x77   : > { %v712_v53 = vpop.eup %711  ;;  %v379_v55 = vsel %vm279_vm0, %v710_v49, 0.0  ;;  %v464_v41 = vadd.f32 %v463_v28, %v462_v34  ;;  %731 = vpow2.f32 %v364_v7  ;;  %v370_v47 = vmul.f32 1.442695, %v334_v29 }
  0x78   : > { %v714_v58 = vpop.eup %713  ;;  %v378_v60 = vadd.f32 %v377_v51, %v376_v50  ;;  %v381_v63 = vsel %vm279_vm0, %v712_v53, 0.0  ;;  %733 = vpow2.f32 %v366_v8  ;;  %v469_v4 = vsel %vm279_vm0, %v442_v40, 0.0 }
  0x79   : > { %v716_v6 = vpop.eup %715  ;;  %v383_v21 = vsel %vm279_vm0, %v714_v58, 0.0  ;;  %v466_v45 = vadd.f32 %v465_v38, %v464_v41  ;;  %v444_v49 = vsel %vm425_vm12, %v1058_v14, 0.0  ;;  %735 = vpow2.f32 %v368_v9 }
  0x7a   : > { %v380_v15 = vadd.f32 %v379_v55, %v378_v60  ;;  %v718_v24 = vpop.eup %717  ;;  %v385_v30 = vsel %vm279_vm0, %v716_v6, 0.0  ;;  %v372_v52 = vmul.f32 1.442695, %v335_v39  ;;  %v471_v53 = vsel %vm279_vm0, %v443_v44, 0.0 }
  0x7b   : > { %v720_v35 = vpop.eup %719  ;;  %v387_v1 = vsel %vm279_vm0, %v718_v24, 0.0  ;;  %v468_v50 = vadd.f32 %v467_v3, %v466_v45  ;;  %v445_v55 = vsel %vm426_vm13, %v1069_v19, 0.0  ;;  %737 = vpow2.f32 %v370_v47 }
  0x7c   : > { %v382_v27 = vadd.f32 %v381_v63, %v380_v15  ;;  %v722_v2 = vpop.eup %721  ;;  %v389_v43 = vsel %vm279_vm0, %v720_v35, 0.0  ;;  %vm428_vm15 = vcmp.eq.s32.totalorder %v1132_v17, 14  ;;  %v473_v14 = vsel %vm279_vm0, %v444_v49, 0.0 }
  0x7d   : > { %v724_v46 = vpop.eup %723  ;;  %v391_v48 = vsel %vm279_vm0, %v722_v2, 0.0  ;;  %v470_v5 = vadd.f32 %v469_v4, %v468_v50  ;;  %v446_v60 = vsel %vm427_vm14, %v1072_v20, 0.0  ;;  %739 = vpow2.f32 %v372_v52 }
  0x7e   : > { %v384_v36 = vadd.f32 %v383_v21, %v382_v27  ;;  %v726_v51 = vpop.eup %725  ;;  %v393_v54 = vsel %vm279_vm0, %v724_v46, 0.0  ;;  %vm429_vm1 = vcmp.eq.s32.totalorder %v1132_v17, 15  ;;  %v475_v19 = vsel %vm279_vm0, %v445_v55, 0.0 }
  0x7f   : > { %v728_v57 = vpop.eup %727  ;;  %v395_v59 = vsel %vm279_vm0, %v726_v51, 0.0  ;;  %v472_v61 = vadd.f32 %v471_v53, %v470_v5  ;;  %v447_v12 = vsel %vm428_vm15, %v1079_v25, 0.0  ;;  %vm430_vm2 = vcmp.eq.s32.totalorder %v1132_v17, 16  ;;  %v497_v53 = vld [vmem:[#allocation2] sm:$0x3] }
  0x80   : > { %v386_v42 = vadd.f32 %v385_v30, %v384_v36  ;;  %v730_v62 = vpop.eup %729  ;;  %v397_v0 = vsel %vm279_vm0, %v728_v57, 0.0  ;;  %v477_v16 = vsel %vm279_vm0, %v446_v60, 0.0  ;;  %v448_v18 = vsel %vm429_vm1, %v1082_v26, 0.0 }
  0x81   : > { %v474_v6 = vadd.f32 %v473_v14, %v472_v61  ;;  %v732_v13 = vpop.eup %731  ;;  %v399_v20 = vsel %vm279_vm0, %v730_v62, 0.0  ;;  %vm431_vm3 = vcmp.eq.s32.totalorder %v1132_v17, 17  ;;  %v479_v24 = vsel %vm279_vm0, %v447_v12, 0.0 }
  0x82   : > { %v388_v10 = vadd.f32 %v387_v1, %v386_v42  ;;  %v734_v22 = vpop.eup %733  ;;  %v401_v25 = vsel %vm279_vm0, %v732_v13, 0.0  ;;  %v449_v7 = vsel %vm430_vm2, %v1089_v31, 0.0  ;;  %vm432_vm4 = vcmp.eq.s32.totalorder %v1132_v17, 18 }
  0x83   : > { %v476_v21 = vadd.f32 %v475_v19, %v474_v6  ;;  %v736_v28 = vpop.eup %735  ;;  %v481_v30 = vsel %vm279_vm0, %v448_v18, 0.0  ;;  %v403_v26 = vsel %vm279_vm0, %v734_v22, 0.0  ;;  %v450_v33 = vsel %vm431_vm3, %v1092_v32, 0.0 }
  0x84   : > { %v390_v11 = vadd.f32 %v389_v43, %v388_v10  ;;  %v483_v36 = vsel %vm279_vm0, %v449_v7, 0.0  ;;  %v405_v38 = vsel %vm279_vm0, %v736_v28, 0.0  ;;  %v451_v31 = vsel %vm432_vm4, %v1099_v37, 0.0 }
  0x85   : > { %v478_v27 = vadd.f32 %v477_v16, %v476_v21  ;;  %v738_v35 = vpop.eup %737  ;;  %v485_v41 = vsel %vm279_vm0, %v450_v33, 0.0  ;;  %v487_v32 = vsel %vm279_vm0, %v451_v31, 0.0  ;;  %vm489_vm5 = vcmp.ne.s32.totalorder %v1132_v17, 19 }
  0x86   : > { %v392_v58 = vadd.f32 %v391_v48, %v390_v11  ;;  %v407_v2 = vsel %vm279_vm0, %v738_v35, 0.0  ;;  %vm516_vm6 = vcmask 0  }
  0x87   : > { %v480_v34 = vadd.f32 %v479_v24, %v478_v27  ;;  %v740_v1 = vpop.eup %739 }
  0x88   : > { %v394_v63 = vadd.f32 %v393_v54, %v392_v58  ;;  %v409_v3 = vsel %vm279_vm0, %v740_v1, 0.0 }
  0x89   : > { %v482_v39 = vadd.f32 %v481_v30, %v480_v34 }
  0x8a   : > { %v396_v15 = vadd.f32 %v395_v59, %v394_v63 }
  0x8b   : > { %v484_v9 = vadd.f32 %v483_v36, %v482_v39 }
  0x8c   : > { %v398_v23 = vadd.f32 %v397_v0, %v396_v15 }
  0x8d   : > { %v486_v43 = vadd.f32 %v485_v41, %v484_v9 }
  0x8e   : > { %v400_v29 = vadd.f32 %v399_v20, %v398_v23 }
  0x8f   : > { %v488_v45 = vadd.f32 %v487_v32, %v486_v43 }
  0x90   : > { %v402_v8 = vadd.f32 %v401_v25, %v400_v29 }
  0x92   : > { %v404_v40 = vadd.f32 %v403_v26, %v402_v8 }
  0x94   : > { %v406_v42 = vadd.f32 %v405_v38, %v404_v40 }
  0x96   : > { %v408_v44 = vadd.f32 %v407_v2, %v406_v42 }
  0x98   : > { %v410_v46 = vadd.f32 %v409_v3, %v408_v44 }
  0x9a   : > { %741 = vlog2.f32 %v410_v46 }
  0xa4   : > { %v742_v47 = vpop.eup %741 }
  0xa5   : > { %v412_v37 = vmul.f32 0.6931472, %v742_v47 }
  0xa7   : > { %v413_v10 = vadd.f32 %v412_v37, %v1115_v56 }
  0xa9   : > { %v490_v4 = vsub.f32 %v488_v45, %v413_v10 }
  0xab   : > { %v491_v48 = vsel %vm489_vm5, %v490_v4, 0.0 }
  0xac   : > { %v492_v49 = vmin.f32 %v491_v48, 0.0 }
  0xae   : > { %v493_v50 = vmul.f32 1.442695, %v492_v49 }
  0xb0   : > { %743 = vpow2.f32 %v493_v50 }
  0xba   : > { %v744_v51 = vpop.eup %743 }
  0xbb   : > { %v495_v52 = vsub.f32 1.0, %v744_v51 }
  0xbd   : > { %v496_v11 = vmul.f32 %v495_v52, %v495_v52 }
  0xbf   : > { %v498_v54 = vmul.f32 %v496_v11, %v492_v49 }
  0xc1   : > { %v499_v55 = vsub.f32 %v497_v53, %v498_v54 }
  0xc3   : > { %500 = vst [vmem:[#allocation2] sm:$0x3] %v499_v55 }
  0xca   : > { %v504_v5 = vld [vmem:[#allocation2] sm:$0x3] }
  0xcb   : > { %v505_v57 = vsel %vm279_vm0, %v504_v5, 0.0 }
  0xcc   : > { %506 = vadd.xlane.f32.xlu0 %v505_v57 }
 0x159   : > { %v507_v56 = vpop.xlane.xlu0 %506 }
 0x15a   : > { %v508_v17 = vrot.slane %v507_v56, 4 }
 0x15c   : > { %v509_v58 = vadd.f32 %v508_v17, %v507_v56 }
 0x15e   : > { %v510_v14 = vrot.slane %v509_v58, 2 }
 0x160   : > { %v511_v59 = vadd.f32 %v510_v14, %v509_v58 }
 0x162   : > { %v512_v60 = vrot.slane %v511_v59, 1 }
 0x164   : > { %v513_v61 = vadd.f32 %v512_v60, %v511_v59 }
 0x166   : > { %638 = vpush %v513_v61 }
 0x197   : > { %s639_s7 = spop %638 }
 0x198   : > { %v515_v62 = vstv %s639_s7 }
 0x199   : > { %517 = vst.msk [vmem:[%s253_s4] sm:$0x1] %vm516_vm6, %v515_v62 }
 0x19a PF: > { %s18_s14 = sadd.s32 1, %s859_s14   ;;  %s1291_s9 = smov %s843_s10 }
 0x19b   : > { %p15_p9 = scmp.ge.s32.totalorder %s18_s14, 4   ;;  %s1292_s10 = smov %s847_s11 }
 0x19c   : > { %s1293_s11 = smov %s926_s20  ;;  %s1294_s12 = smov %s855_s13 }
 0x19d   : > { %s1295_s13 = smov %s1297_s16  ;;  %17 = sbr.rel (!%p15_p9) target bundleno = 6 (0x6), region = 89 }
 0x1a4   :  { %541 = vsyncpa [#allocation4], 1 }
 0x1a5   :  { %543 = vsyncpa [#allocation4 + $0x1], 1 }
 0x1a6   :  { %544 = vsyncpa [#allocation6], 1 }
 0x1a7   :  { %546 = vsyncpa [#allocation6 + $0x1], 1 }

</bundles_post_ra>
